<compile_context>
chip_gen: v7x
topology: tpu7x:2x2x1
jax: 0.10.0
libtpu: 0.0.40
codegen_flags: <defaults>
</compile_context>

<pallas_src>
import jax
import jax.numpy as jnp
from jax.experimental import pallas as pl
from jax.experimental.pallas import tpu as pltpu

_LANE = 128
_MAX_BLOCK_BYTES = 2 * 1024 * 1024  # <=2 MiB/block: safe inside v5e's 16 MiB scoped VMEM


def squeeze_pallas(x: jax.Array, dim: int) -> jax.Array:
    """torch.Tensor.squeeze(dim): metadata-only -> no kernel (perf review #1)."""
    ndim = x.ndim
    if not (-ndim <= dim < ndim):
        raise IndexError(f"dim {dim} out of range for tensor of rank {ndim}")
    dim = dim % ndim
    if x.shape[dim] != 1:
        return x  # torch semantics: no-op when the dim is not size-1
    return jnp.squeeze(x, axis=dim)


def _output_head_kernel(x_ref, w_ref, o_ref):
    # x_ref: (1, D, TN) activations from the Conv3d (channel dim already size-1
    #        and folded away by the wrapper's free reshape == Squeeze(dim=1)).
    # w_ref: (Cout, D)  -- the 1x1 Conv2d weight, i.e. a plain matmul.
    # o_ref: (1, Cout, TN)
    x = x_ref[0]
    x = jnp.where(x > 0, x, 0.01 * x)                     # LeakyReLU(0.01), VPU
    y = jnp.dot(w_ref[...], x,                            # 1x1 conv == MXU matmul
                preferred_element_type=jnp.float32)
    o_ref[0] = (jnp.tanh(y) * 0.5 + 0.5).astype(o_ref.dtype)   # tanh on EUP, then /2 + 0.5


def _pick_tn(hw: int, d: int, itemsize: int) -> int:
    """Largest multiple of 128 that evenly divides hw with block <= ~2 MiB."""
    if hw % _LANE != 0:
        return hw  # full-extent last dim is always legal for BlockSpec
    k = hw // _LANE
    cap = max(1, _MAX_BLOCK_BYTES // (d * itemsize * _LANE))
    for m in range(min(k, cap), 0, -1):
        if k % m == 0:
            return m * _LANE
    return _LANE


def inet_output_head(x: jax.Array, w2: jax.Array) -> jax.Array:
    """Fused INet.output tail after the Conv3d:
       LeakyReLU -> Squeeze(dim=1) -> Conv2d(64,64,k=1,bias=False) -> Tanh, then /2 + 0.5.

    x : (B, 1, D, H, W)  output of Conv3d(num_filters, 1, 3, padding=1)
    w2: (Cout, D)        weight of the 1x1 Conv2d (Cout = D = 64 in INet)
    returns (B, Cout, H, W)
    """
    B, C1, D, H, W = x.shape
    assert C1 == 1, "expected the size-1 channel dim produced by Conv3d(out_channels=1)"
    Cout, Cin = w2.shape
    assert Cin == D
    HW = H * W
    itemsize = jnp.dtype(x.dtype).itemsize

    # Squeeze(dim=1) is metadata-only: fold it into a free reshape to a
    # lane-dense (B, D, H*W) slab (last dim a multiple of 128 for H*W >= 128).
    x2 = x.reshape(B, D, HW)

    tn = _pick_tn(HW, D, itemsize)
    grid = (B, HW // tn)  # tn divides HW exactly -> no masked tail block

    out2 = pl.pallas_call(
        _output_head_kernel,
        out_shape=jax.ShapeDtypeStruct((B, Cout, HW), x.dtype),
        grid=grid,
        in_specs=[
            pl.BlockSpec((1, D, tn), lambda b, j: (b, 0, j)),
            pl.BlockSpec((Cout, Cin), lambda b, j: (0, 0)),
        ],
        out_specs=pl.BlockSpec((1, Cout, tn), lambda b, j: (b, 0, j)),
        compiler_params=pltpu.CompilerParams(
            dimension_semantics=("parallel", "parallel"),
        ),
        cost_estimate=pl.CostEstimate(
            flops=2 * B * Cout * D * HW,
            transcendentals=B * Cout * HW,
            bytes_accessed=(B * D * HW + Cout * D + B * Cout * HW) * itemsize,
        ),
    )(x2, w2)

    return out2.reshape(B, Cout, H, W)


if __name__ == "__main__":
    key = jax.random.PRNGKey(0)
    kx, kw = jax.random.split(key)

    # Shapes consistent with INet.output: Conv3d(32 -> 1) produces (B, 1, 64, H, W);
    # Squeeze(dim=1) -> (B, 64, H, W) feeding Conv2d(64, 64, kernel_size=1, bias=False).
    B, D, H, W = 2, 64, 16, 16
    x = jax.random.normal(kx, (B, 1, D, H, W), dtype=jnp.float32)
    w2 = jax.random.normal(kw, (64, D), dtype=jnp.float32) * 0.1

    out = jax.block_until_ready(inet_output_head(x, w2))

    # Pure-JAX reference of the same fused tail.
    xa = jnp.where(x > 0, x, 0.01 * x)                 # LeakyReLU
    xs = squeeze_pallas(xa, 1)                         # (B, 64, H, W), metadata-only
    yr = jnp.einsum("od,bdhw->bohw", w2, xs)           # 1x1 Conv2d, no bias
    ref = jnp.tanh(yr) / 2.0 + 0.5

    assert out.shape == ref.shape == (B, 64, H, W), out.shape
    assert out.dtype == ref.dtype
    assert bool(jnp.allclose(out, ref, rtol=1e-3, atol=1e-3)), float(jnp.max(jnp.abs(out - ref)))

    # The Squeeze stage alone stays a zero-cost metadata op (perf review #1).
    assert squeeze_pallas(x, 1).shape == (B, D, H, W)

    # TODO(synk): the Conv3d(3x3x3) preceding this head, plus the rest of INet
    # (Conv2d/Conv3d stacks, GroupNorm, trilinear Upsample, Linear, Dropout),
    # is left to XLA; only the fused output head is kernelized here.
    print("KERNEL_OK")
</pallas_src>

<mosaic_0001>
module attributes {stable_mosaic.version = 11 : i64} {
  func.func @_output_head_kernel(%arg0: i32, %arg1: i32, %arg2: memref<1x64x256xf32, #tpu.memory_space<vmem>>, %arg3: memref<64x64xf32, #tpu.memory_space<vmem>>, %arg4: memref<1x64x256xf32, #tpu.memory_space<vmem>>) attributes {dimension_semantics = [#tpu.dimension_semantics<parallel>, #tpu.dimension_semantics<parallel>], iteration_bounds = array<i64: 2, 1>, scalar_prefetch = 0 : i64, scratch_operands = 0 : i64, tpu.core_type = #tpu.core_type<tc>, window_params = [{transform_indices = @transform_0, window_bounds = array<i64: 1, 64, 256>}, {pipeline_mode = #tpu.pipeline_mode<synchronous>, transform_indices = @transform_1, window_bounds = array<i64: 64, 64>}, {transform_indices = @transform_2, window_bounds = array<i64: 1, 64, 256>}]} {
    %c0 = arith.constant 0 : index
    %c0_0 = arith.constant 0 : index
    %c0_1 = arith.constant 0 : index
    %0 = vector.load %arg2[%c0, %c0_0, %c0_1] : memref<1x64x256xf32, #tpu.memory_space<vmem>>, vector<1x64x256xf32>
    %1 = vector.shape_cast %0 : vector<1x64x256xf32> to vector<64x256xf32>
    %cst = arith.constant 0.000000e+00 : f32
    %2 = vector.broadcast %cst : f32 to vector<64x256xf32>
    %3 = arith.cmpf ogt, %1, %2 : vector<64x256xf32>
    %cst_2 = arith.constant 0.00999999977 : f32
    %4 = vector.broadcast %cst_2 : f32 to vector<64x256xf32>
    %5 = arith.mulf %4, %1 : vector<64x256xf32>
    %6 = arith.select %3, %1, %5 : vector<64x256xi1>, vector<64x256xf32>
    %c0_3 = arith.constant 0 : index
    %c0_4 = arith.constant 0 : index
    %7 = vector.load %arg3[%c0_3, %c0_4] : memref<64x64xf32, #tpu.memory_space<vmem>>, vector<64x64xf32>
    %cst_5 = arith.constant dense<0.000000e+00> : vector<64x256xf32>
    %8 = tpu.matmul %7, %6, %cst_5 {dimension_numbers = #tpu.dot_dimension_numbers<[1], [0], [0], [1], [0, 0, 1, 1], [], []>} : vector<64x64xf32>, vector<64x256xf32>, vector<64x256xf32> -> vector<64x256xf32>
    %9 = math.tanh %8 : vector<64x256xf32>
    %cst_6 = arith.constant 5.000000e-01 : f32
    %10 = vector.broadcast %cst_6 : f32 to vector<64x256xf32>
    %11 = arith.mulf %9, %10 : vector<64x256xf32>
    %cst_7 = arith.constant 5.000000e-01 : f32
    %12 = vector.broadcast %cst_7 : f32 to vector<64x256xf32>
    %13 = arith.addf %11, %12 : vector<64x256xf32>
    %c0_8 = arith.constant 0 : index
    %c0_9 = arith.constant 0 : index
    %c0_10 = arith.constant 0 : index
    %14 = vector.load %arg4[%c0_8, %c0_9, %c0_10] : memref<1x64x256xf32, #tpu.memory_space<vmem>>, vector<1x64x256xf32>
    %15 = vector.shape_cast %14 : vector<1x64x256xf32> to vector<64x256xf32>
    %16 = vector.shape_cast %13 : vector<64x256xf32> to vector<1x64x256xf32>
    tpu.vector_store %arg4[%c0_8, %c0_9, %c0_10], %16 {strides = array<i32>} : memref<1x64x256xf32, #tpu.memory_space<vmem>>, vector<1x64x256xf32>,
    return
  }
  func.func @transform_0(%arg0: i32, %arg1: i32) -> (i32, i32, i32) {
    %c0_i32 = arith.constant 0 : i32
    %c0_i32_0 = arith.constant 0 : i32
    return %arg0, %c0_i32, %arg1 : i32, i32, i32
  }
  func.func @transform_1(%arg0: i32, %arg1: i32) -> (i32, i32) {
    %c0_i32 = arith.constant 0 : i32
    %c0_i32_0 = arith.constant 0 : i32
    %c0_i32_1 = arith.constant 0 : i32
    return %c0_i32, %c0_i32_0 : i32, i32
  }
  func.func @transform_2(%arg0: i32, %arg1: i32) -> (i32, i32, i32) {
    %c0_i32 = arith.constant 0 : i32
    %c0_i32_0 = arith.constant 0 : i32
    return %arg0, %c0_i32, %arg1 : i32, i32, i32
  }
}

</mosaic_0001>

<bundles_post_ra>
// kernel: tpu_custom_call.1
= control target key start
LH: loop header
LB: loop body
LE: loop exit
PB: predicated region body
PF: predicated region fallthrough
CT: control target
= control target key end

     0   :  { %7 = vsyncpa [#allocation3], 0  ;;  %s1201_s0 = inlined_call_operand.hbm [shape: f32[2,64,256], index: 0, kind: input, shape index: {}]   ;;  %s1202_s1 = inlined_call_operand.hbm [shape: f32[64,64], index: 1, kind: input, shape index: {}]   ;;  %s1203_s2 = inlined_call_operand.hbm [shape: f32[2,64,256], index: 2, kind: output, shape index: {}]  }
   0x1   :  { %9 = vsyncpa [#allocation3 + $0x1], 0 }
   0x2   :  { %10 = vsyncpa [#allocation6], 0 }
   0x3   :  { %11 = vsyncpa [#allocation4], 0 }
   0x4   :  { %13 = vsyncpa [#allocation4 + $0x1], 0  ;;  %s918_s9 = smov 0   ;;  %s920_s10 = smov 0  }
   0x5   :  { %s922_s11 = smov 0   ;;  %s924_s12 = smov 0  }
   0x6   :  { %s926_s13 = smov 0   ;;  %s928_s14 = smov 0  }
   0x7 LB: > { %s584_s15 = sadd.s32 4294967295, %s891_s14   ;;  %s585_s16 = sadd.s32 4294967294, %s891_s14   ;;  %s891_s14 = sphi %s928_s14, %s19_s14   ;;  %s887_s13 = sphi %s926_s13, %s1227_s13   ;;  %s883_s12 = sphi %s924_s12, %s1226_s12   ;;  %s879_s11 = sphi %s922_s11, %s1225_s11   ;;  %s875_s10 = sphi %s920_s10, %s1224_s10   ;;  %s871_s9 = sphi %s918_s9, %s1223_s9  }
   0x8   : > { %p53_p0 = scmp.ne.s32.totalorder %s875_s10, %s871_s9  ;;  %p952_p1 = scmp.eq.s32.totalorder %s584_s15, 0 }
   0x9   : > { %p956_p2 = scmp.eq.s32.totalorder %s584_s15, 1  ;;  %p106_p3 = scmp.eq.s32.totalorder %s585_s16, 1 }
   0xa   : > { %s1208_s17 = scalar_select %p952_p1, 1, 0 }
   0xb   : > { %s1209_s18 = scalar_select %p956_p2, 1, 0 }
   0xc   : > { %p962_p4 = por %p952_p1, %p53_p0  ;;  %p586_p5 = scmp.ge.s32.totalorder %s891_s14, 1 }
   0xd   : > { %p967_p6 = por %p106_p3, %p53_p0  ;;  %p113_p7 = scmp.lt.s32.totalorder %s891_s14, 3 }
   0xe   : > { %s1210_s19 = scalar_select %p962_p4, 1, 0 }
   0xf   : > { %s1211_s20 = scalar_select %p967_p6, 1, 0 }
  0x10   : > { %p972_p8 = pnand %p586_p5, %p113_p7  ;;  %s893_s22 = smov [#allocation5]  }
  0x11   : > { %s125_s23 = sshll.u32 %s893_s22, 4  ;;  %s31_s25 = sadd.s32 1, %s887_s13  ;;  %s126_s23 = int_to_ptr.vmem [resolvable:$true] %s125_s23 }
  0x12   : > { %s1212_s21 = scalar_select %p972_p8, 1, 0 }
  0x13   : > { %p643_p9 = pneg %p972_p8  ;;  %s747_s28 = scalar_lea.hbm %s1202_s1, 1024 }
  0x14   : > { %p748_p12 = scmp.ne.s32.totalorder %s1202_s1, %s747_s28  ;;  %p754_p5 = scmp.lt.u32.totalorder %s747_s28, %s1202_s1 }
  0x15   : > { %p981_p11 = pnand %p643_p9, %p952_p1 }
  0x17   : > { %p749_p13 = pneg %p981_p11 }
  0x19   : > { %p750_p0 = pnand %p749_p13, %p748_p12 }
  0x1b   : > { %p751_p3 = pneg %p750_p0 }
  0x1d   : > { %p756_p7 = pnand %p754_p5, %p751_p3 }
  0x1f   : > { %759 = shalt.err (!%p756_p7)
}
  0x20   : > { %s760_s5 = scalar_lea.vmem %s126_s23, 1024  ;;  %p768_p1 = scmp.lt.s32.totalorder %s126_s23, %s126_s23 }
  0x21   : > { %p761_p9 = scmp.ne.s32.totalorder %s126_s23, %s760_s5  ;;  %p769_p4 = scmp.lt.s32.totalorder %s760_s5, %s760_s5 }
  0x23   : > { %p763_p10 = pnand %p761_p9, %p749_p13  ;;  %p770_p8 = por %p769_p4, %p768_p1 }
  0x25   : > { %p764_p6 = pneg %p763_p10 }
  0x27   : > { %p771_p2 = pnand %p770_p8, %p764_p6 }
  0x29   : > { %774 = shalt.err (!%p771_p2)
}
  0x2a   : > { %s894_s6 = smov 128   ;;  %s895_s7 = smov 8  }
  0x2b   : > { %646 = dma.hbm_to_vmem [thread:$0]  (!%p981_p11), %s1202_s1, 1024, %s126_s23, [#allocation6], %s894_s6, %s894_s6, %s895_s7  }
  0x2c   : > { %p33_p1 = scmp.ge.s32.totalorder %s31_s25, 2  ;;  %s40_s16 = sadd.s32 1, %s879_s11 }
  0x2d   : > { %p47_p2 = scmp.ne.s32.totalorder %s879_s11, %s875_s10  ;;  %p48_p4 = scmp.eq.s32.totalorder %s891_s14, 0 }
  0x2e   : > { %s1229_s25 = smov (%p33_p1, %s31_s25), 0  ;;  %p1215_p8 = scmp.ne.s32.totalorder %s1209_s18, 0 }
  0x2f   : > { %p1008_p6 = por %p48_p4, %p47_p2  ;;  %s35_s24 = ssub.s32 %s887_s13, %s1229_s25 }
  0x30   : > { %p1014_p10 = por %p1215_p8, %p47_p2  ;;  %p656_p12 = scmp.lt.s32.totalorder %s891_s14, 2 }
  0x31   : > { %p38_p11 = scmp.eq.s32.totalorder %s35_s24, 0  ;;  %s139_s23 = sand.u32 1, %s879_s11  }
  0x32   : > { %s589_s27 = sshll.u32 %s139_s23, 7  ;;  %s609_s29 = sshll.u32 %s887_s13, 11 }
  0x33   : > { %s1023_s28 = scalar_select %p38_p11, %s879_s11, %s40_s16  }
  0x34   : > { %s1029_s4 = scalar_lea.hbm %s1201_s0, %s609_s29  ;;  %s143_s18 = scalar_lea.vmem [#allocation2], %s589_s27 }
  0x35   : > { %s152_s5 = sshll.u32 %s143_s18, 4  ;;  %p1035_p13 = pnand %p656_p12, %p1008_p6  ;;  %s1031_s5 = int_to_ptr.vmem [resolvable:$true] %s152_s5 }
  0x36   : > { %s1039_s7 = scalar_lea.sflag [#allocation3], %s139_s23  ;;  %s775_s8 = scalar_lea.hbm %s1029_s4, 2048 }
  0x37   : > { %p776_p0 = scmp.ne.s32.totalorder %s1029_s4, %s775_s8  ;;  %p777_p3 = pneg %p1035_p13 }
  0x38   : > { %s780_s22 = scalar_lea.hbm %s1201_s0, 4096  ;;  %p781_p9 = scmp.lt.u32.totalorder %s1029_s4, %s1201_s0 }
  0x39   : > { %p778_p5 = pnand %p777_p3, %p776_p0  ;;  %p782_p1 = scmp.lt.u32.totalorder %s780_s22, %s775_s8 }
  0x3a   : > { %p784_p4 = scmp.lt.u32.totalorder %s775_s8, %s1029_s4 }
  0x3b   : > { %p779_p7 = pneg %p778_p5  ;;  %p783_p2 = por %p782_p1, %p781_p9 }
  0x3d   : > { %p785_p6 = por %p784_p4, %p783_p2 }
  0x3f   : > { %p786_p8 = pnand %p785_p6, %p779_p7 }
  0x41   : > { %789 = shalt.err (!%p786_p8)
}
  0x42   : > { %s790_s23 = scalar_lea.vmem %s1031_s5, 2048  ;;  %s896_s29 = smov [#allocation2]  }
  0x43   : > { %p791_p12 = scmp.ne.s32.totalorder %s1031_s5, %s790_s23  ;;  %s795_s30 = sshll.u32 %s896_s29, 4  ;;  %s796_s30 = int_to_ptr.vmem [resolvable:$false] %s795_s30 }
  0x44   : > { %s797_s3 = scalar_lea.vmem %s796_s30, 4096  ;;  %p798_p5 = scmp.lt.s32.totalorder %s1031_s5, %s796_s30 }
  0x45   : > { %p793_p11 = pnand %p791_p12, %p777_p3  ;;  %p799_p9 = scmp.lt.s32.totalorder %s797_s3, %s790_s23 }
  0x47   : > { %p794_p0 = pneg %p793_p11  ;;  %p800_p1 = por %p799_p9, %p798_p5 }
  0x49   : > { %p801_p2 = pnand %p800_p1, %p794_p0 }
  0x4b   : > { %804 = shalt.err (!%p801_p2)
}
  0x4c   : > { %s897_s18 = smov 256   ;;  %s898_s8 = smov 16  }
  0x4d   : > { %650 = dma.hbm_to_vmem [thread:$0]  (!%p1035_p13), %s1029_s4, 2048, %s1031_s5, %s1039_s7, %s897_s18, %s897_s18, %s898_s8  }
  0x4e   : > { %p1218_p3 = scmp.ne.s32.totalorder %s1212_s21, 0 }
  0x4f   : > { %s1070_s15 = sand.u32 (!%p1218_p3), 1, %s875_s10   ;;  %p1219_p7 = scmp.ne.s32.totalorder (!%p1218_p3), %s1210_s19, 0 }
  0x50   : > { %164 = sbr.rel (%p1218_p3) target bundleno = 372 (0x174), region = 28  ;;  %s593_s16 = sshll.u32 (!%p1218_p3), %s1070_s15, 7 }
  0x51   : > { %s167_s22 = scalar_lea.sflag (!%p1218_p3), [#allocation3], %s1070_s15  ;;  %s1076_s24 = scalar_lea.vmem (!%p1218_p3), [#allocation2], %s593_s16 }
  0x57   : > { %858 = dma.done.wait (%p1219_p7), %s167_s22, 2048  }
  0x58   : > { %860 = vsyncadd (%p1219_p7), %s167_s22, 4294965248  ;;  %p1220_p13 = scmp.ne.s32.totalorder %s1208_s17, 0 }
  0x5a   : > { %862 = dma.done.wait (%p1220_p13), [#allocation6], 1024  }
  0x5b   : > { %864 = vsyncadd (%p1220_p13), [#allocation6], 4294966272  ;;  %v899_v0 = vmov 0.0   ;;  %v198_v1 = vld [vmem:[%s1076_s24 + $0x8] sm:$0xff]  ;;  %v200_v2 = vld [vmem:[%s1076_s24 + $0x18] sm:$0xff]  ;;  %s1127_s17 = scalar_lea.vmem [#allocation7], %s593_s16 }
  0x5c   : > { %358 = vmatprep.mubr.f32.mxu0 %v899_v0  ;;  %382 = vmatprep.mubr.f32.mxu1 %v899_v0  ;;  %v197_v3 = vld [vmem:[%s1076_s24] sm:$0xff]  ;;  %vm214_vm0 = vcmp.gt.f32.partialorder %v198_v1, 0.0  ;;  %vm216_vm1 = vcmp.gt.f32.partialorder %v200_v2, 0.0  ;;  %v230_v4 = vmul.f32 0.01, %v198_v1  ;;  %v199_v6 = vld [vmem:[%s1076_s24 + $0x10] sm:$0xff] }
  0x5d   : > { %v232_v5 = vmul.f32 0.01, %v200_v2  ;;  %vm213_vm2 = vcmp.gt.f32.partialorder %v197_v3, 0.0  ;;  %v229_v7 = vmul.f32 0.01, %v197_v3  ;;  %v202_v8 = vld [vmem:[%s1076_s24 + $0x28] sm:$0xff] }
  0x5e   : > { %v204_v9 = vld [vmem:[%s1076_s24 + $0x38] sm:$0xff]  ;;  %v246_v10 = vsel %vm214_vm0, %v198_v1, %v230_v4  ;;  %vm215_vm3 = vcmp.gt.f32.partialorder %v199_v6, 0.0  ;;  %v231_v12 = vmul.f32 0.01, %v199_v6  ;;  %v201_v13 = vld [vmem:[%s1076_s24 + $0x20] sm:$0xff]  ;;  %v203_v14 = vld [vmem:[%s1076_s24 + $0x30] sm:$0xff] }
  0x5f   : > { %v248_v11 = vsel %vm216_vm1, %v200_v2, %v232_v5  ;;  %v245_v16 = vsel %vm213_vm2, %v197_v3, %v229_v7  ;;  %vm218_vm4 = vcmp.gt.f32.partialorder %v202_v8, 0.0  ;;  %vm220_vm5 = vcmp.gt.f32.partialorder %v204_v9, 0.0  ;;  %v206_v17 = vld [vmem:[%s1076_s24 + $0x48] sm:$0xff]  ;;  %v208_v18 = vld [vmem:[%s1076_s24 + $0x58] sm:$0xff]  ;;  %v205_v22 = vld [vmem:[%s1076_s24 + $0x40] sm:$0xff]  ;;  %s610_s19 = sshll.u32 %s883_s12, 11 }
  0x60   : > { %v611_v15 = vpack.c.bf16 %v248_v11, %v246_v10  ;;  %v247_v19 = vsel %vm215_vm3, %v199_v6, %v231_v12  ;;  %v234_v20 = vmul.f32 0.01, %v202_v8  ;;  %v236_v21 = vmul.f32 0.01, %v204_v9  ;;  %v207_v26 = vld [vmem:[%s1076_s24 + $0x50] sm:$0xff]  ;;  %v210_v29 = vld [vmem:[%s1076_s24 + $0x68] sm:$0xff]  ;;  %s1147_s6 = scalar_lea.hbm %s1203_s2, %s610_s19 }
  0x61   : > { %vm217_vm6 = vcmp.gt.f32.partialorder %v201_v13, 0.0  ;;  %v613_v23 = vpack.c.bf16 %v247_v19, %v245_v16  ;;  %vm219_vm7 = vcmp.gt.f32.partialorder %v203_v14, 0.0  ;;  %v233_v24 = vmul.f32 0.01, %v201_v13  ;;  %v212_v34 = vld [vmem:[%s1076_s24 + $0x78] sm:$0xff]  ;;  %v209_v37 = vld [vmem:[%s1076_s24 + $0x60] sm:$0xff] }
  0x62   : > { %612 = vmatprep.subr.bf16.mxu0 %v611_v15  ;;  %627 = vmatprep.subr.bf16.mxu1 %v611_v15  ;;  %v235_v25 = vmul.f32 0.01, %v203_v14  ;;  %v250_v27 = vsel %vm218_vm4, %v202_v8, %v234_v20  ;;  %v252_v28 = vsel %vm220_vm5, %v204_v9, %v236_v21  ;;  %vm222_vm8 = vcmp.gt.f32.partialorder %v206_v17, 0.0  ;;  %v211_v41 = vld [vmem:[%s1076_s24 + $0x70] sm:$0xff]  ;;  %v261_v57 = vld [vmem:[#allocation5] sm:$0xff]  ;;  %v262_v59 = vld [vmem:[#allocation5 + $0x8] sm:$0xff] }
  0x63   : > { %vm224_vm9 = vcmp.gt.f32.partialorder %v208_v18, 0.0  ;;  %614 = vmatpush1.bf16.msra.mxu0 %v613_v23  ;;  %631 = vmatpush1.bf16.msra.mxu1 %v613_v23  ;;  %v615_v30 = vpack.c.bf16 %v252_v28, %v250_v27  ;;  %v249_v31 = vsel %vm217_vm6, %v201_v13, %v233_v24  ;;  %v238_v33 = vmul.f32 0.01, %v206_v17  ;;  %v265_v58 = vld [vmem:[#allocation5 + $0x20] sm:$0xff]  ;;  %v266_v60 = vld [vmem:[#allocation5 + $0x28] sm:$0xff]  ;;  %v263_v61 = vld [vmem:[#allocation5 + $0x10] sm:$0xff] }
  0x64   : > { %v251_v32 = vsel %vm219_vm7, %v203_v14, %v235_v25  ;;  %v240_v36 = vmul.f32 0.01, %v208_v18  ;;  %vm221_vm10 = vcmp.gt.f32.partialorder %v205_v22, 0.0  ;;  %vm223_vm11 = vcmp.gt.f32.partialorder %v207_v26, 0.0  ;;  %v267_v62 = vld [vmem:[#allocation5 + $0x30] sm:$0xff]  ;;  %v264_v63 = vld [vmem:[#allocation5 + $0x18] sm:$0xff] }
  0x65   : > { %v617_v35 = vpack.c.bf16 %v251_v32, %v249_v31  ;;  %616 = vmatprep.subr.bf16.mxu0 %v615_v30  ;;  %628 = vmatprep.subr.bf16.mxu1 %v615_v30  ;;  %v254_v38 = vsel %vm222_vm8, %v206_v17, %v238_v33  ;;  %v237_v39 = vmul.f32 0.01, %v205_v22  ;;  %v239_v40 = vmul.f32 0.01, %v207_v26  ;;  %v268_v1 = vld [vmem:[#allocation5 + $0x38] sm:$0xff]  ;;  %s487_s21 = sshll.u32 %s1127_s17, 4  ;;  %s1149_s21 = int_to_ptr.vmem [resolvable:$true] %s487_s21 }
  0x66   : > { %vm226_vm12 = vcmp.gt.f32.partialorder %v210_v29, 0.0  ;;  %v256_v42 = vsel %vm224_vm9, %v208_v18, %v240_v36  ;;  %vm228_vm13 = vcmp.gt.f32.partialorder %v212_v34, 0.0  ;;  %v242_v43 = vmul.f32 0.01, %v210_v29  ;;  %s472_s12 = scalar_lea.sflag [#allocation4], %s1070_s15  ;;  %s805_s7 = scalar_lea.vmem %s1149_s21, 2048 }
  0x67   : > { %v244_v44 = vmul.f32 0.01, %v212_v34  ;;  %618 = vmatpush1.bf16.msra.mxu0 %v617_v35  ;;  %632 = vmatpush1.bf16.msra.mxu1 %v617_v35  ;;  %v619_v45 = vpack.c.bf16 %v256_v42, %v254_v38  ;;  %v253_v46 = vsel %vm221_vm10, %v205_v22, %v237_v39  ;;  %v255_v47 = vsel %vm223_vm11, %v207_v26, %v239_v40  ;;  %p806_p4 = scmp.ne.s32.totalorder %s1149_s21, %s805_s7  ;;  %s900_s27 = smov [#allocation7]  }
  0x68   : > { %vm225_vm14 = vcmp.gt.f32.partialorder %v209_v37, 0.0  ;;  %v621_v48 = vpack.c.bf16 %v255_v47, %v253_v46  ;;  %v258_v49 = vsel %vm226_vm12, %v210_v29, %v242_v43  ;;  %vm227_vm15 = vcmp.gt.f32.partialorder %v211_v41, 0.0  ;;  %s809_s23 = sshll.u32 %s900_s27, 4  ;;  %s810_s23 = int_to_ptr.vmem [resolvable:$false] %s809_s23 }
  0x69   : > { %v260_v50 = vsel %vm228_vm13, %v212_v34, %v244_v44  ;;  %620 = vmatprep.subr.bf16.mxu0 %v619_v45  ;;  %629 = vmatprep.subr.bf16.mxu1 %v619_v45  ;;  %v241_v52 = vmul.f32 0.01, %v209_v37  ;;  %v243_v53 = vmul.f32 0.01, %v211_v41  ;;  %vm269_vm0 = vcmask 523264   ;;  %p807_p6 = pnand %p806_p4, %p1014_p10  ;;  %s811_s29 = scalar_lea.vmem %s810_s23, 4096 }
  0x6a   : > { %v623_v51 = vpack.c.bf16 %v260_v50, %v258_v49  ;;  %p812_p12 = scmp.lt.s32.totalorder %s1149_s21, %s810_s23  ;;  %p813_p11 = scmp.lt.s32.totalorder %s811_s29, %s805_s7 }
  0x6b   : > { %622 = vmatpush1.bf16.msra.mxu0 %v621_v48  ;;  %633 = vmatpush1.bf16.msra.mxu1 %v621_v48  ;;  %v257_v54 = vsel %vm225_vm14, %v209_v37, %v241_v52  ;;  %v259_v55 = vsel %vm227_vm15, %v211_v41, %v243_v53  ;;  %p808_p8 = pneg %p807_p6 }
  0x6c   : > { %624 = vmatprep.subr.bf16.mxu0 %v623_v51  ;;  %630 = vmatprep.subr.bf16.mxu1 %v623_v51  ;;  %v625_v56 = vpack.c.bf16 %v259_v55, %v257_v54  ;;  %p814_p0 = por %p813_p11, %p812_p12 }
  0x6e   : > { %p815_p5 = pnand %p814_p0, %p808_p8 }
  0x6f   : > { %626 = vmatpush1.bf16.msra.mxu0 %v625_v56  ;;  %634 = vmatpush1.bf16.msra.mxu1 %v625_v56 }
  0x72   : > { %596 = vmatmul.mubr.msk.f32.vlgmr.msra.gmra.mrb[0].mxu0 %vm269_vm0, %v261_v57  ;;  %600 = vmatmul.mubr.msk.f32.vlgmr.msra.gmra.mrb[0].mxu1 %vm269_vm0, %v265_v58 }
  0x73   : > { %364 = vmatprep.mubr.f32.mxu0 %v899_v0  ;;  %388 = vmatprep.mubr.f32.mxu1 %v899_v0 }
  0x76   : > { %597 = vmatmul.mubr.msk.f32.gmra.mrb[2].mxu0 %vm269_vm0, %v262_v59  ;;  %601 = vmatmul.mubr.msk.f32.gmra.mrb[2].mxu1 %vm269_vm0, %v266_v60 }
  0x77   : > { %370 = vmatprep.mubr.f32.mxu0 %v899_v0  ;;  %394 = vmatprep.mubr.f32.mxu1 %v899_v0 }
  0x7a   : > { %598 = vmatmul.mubr.msk.f32.gmra.mrb[4].mxu0 %vm269_vm0, %v263_v61  ;;  %602 = vmatmul.mubr.msk.f32.gmra.mrb[4].mxu1 %vm269_vm0, %v267_v62 }
  0x7b   : > { %376 = vmatprep.mubr.f32.mxu0 %v899_v0  ;;  %400 = vmatprep.mubr.f32.mxu1 %v899_v0 }
  0x7e   : > { %599 = vmatmul.mubr.msk.f32.gmra.mrb[6].mxu0 %vm269_vm0, %v264_v63  ;;  %603 = vmatmul.mubr.msk.f32.gmra.mrb[6].mxu1 %vm269_vm0, %v268_v1 }
 0x145   : > { %v360_v2 = vpop.f32.mrb[0].mxu0  ;;  %v384_v3 = vpop.f32.mrb[0].mxu1 }
 0x146   : > { %715 = vtanh.f32 %v360_v2  ;;  %v362_v4 = vpop.f32.mrb[1].mxu0  ;;  %v386_v5 = vpop.f32.mrb[1].mxu1 }
 0x147   : > { %717 = vtanh.f32 %v384_v3 }
 0x148   : > { %719 = vtanh.f32 %v362_v4 }
 0x149   : > { %721 = vtanh.f32 %v386_v5  ;;  %v366_v6 = vpop.f32.mrb[2].mxu0  ;;  %v390_v7 = vpop.f32.mrb[2].mxu1 }
 0x14a   : > { %723 = vtanh.f32 %v366_v6  ;;  %v368_v8 = vpop.f32.mrb[3].mxu0  ;;  %v392_v9 = vpop.f32.mrb[3].mxu1 }
 0x14b   : > { %725 = vtanh.f32 %v390_v7 }
 0x14c   : > { %727 = vtanh.f32 %v368_v8 }
 0x14d   : > { %729 = vtanh.f32 %v392_v9  ;;  %v372_v0 = vpop.f32.mrb[4].mxu0  ;;  %v396_v10 = vpop.f32.mrb[4].mxu1 }
 0x14e   : > { %731 = vtanh.f32 %v372_v0  ;;  %v374_v11 = vpop.f32.mrb[5].mxu0  ;;  %v398_v12 = vpop.f32.mrb[5].mxu1 }
 0x14f   : > { %733 = vtanh.f32 %v396_v10 }
 0x150   : > { %v716_v13 = vpop.eup %715  ;;  %735 = vtanh.f32 %v374_v11 }
 0x151   : > { %v718_v14 = vpop.eup %717  ;;  %v423_v15 = vmul.f32 0.5, %v716_v13  ;;  %737 = vtanh.f32 %v398_v12  ;;  %v378_v16 = vpop.f32.mrb[6].mxu0 }
 0x152   : > { %v402_v17 = vpop.f32.mrb[6].mxu1  ;;  %v720_v18 = vpop.eup %719  ;;  %v431_v19 = vmul.f32 0.5, %v718_v14  ;;  %739 = vtanh.f32 %v378_v16 }
 0x153   : > { %v380_v20 = vpop.f32.mrb[7].mxu0  ;;  %v404_v21 = vpop.f32.mrb[7].mxu1  ;;  %v439_v23 = vadd.f32 0.5, %v423_v15  ;;  %v424_v24 = vmul.f32 0.5, %v720_v18  ;;  %741 = vtanh.f32 %v402_v17 }
 0x154   : > { %v722_v22 = vpop.eup %721  ;;  %v447_v26 = vadd.f32 0.5, %v431_v19  ;;  %743 = vtanh.f32 %v380_v20 }
 0x155   : > { %v724_v25 = vpop.eup %723  ;;  %v432_v27 = vmul.f32 0.5, %v722_v22  ;;  %455 = vst [vmem:[%s1127_s17] sm:$0xff] %v439_v23  ;;  %v440_v29 = vadd.f32 0.5, %v424_v24  ;;  %745 = vtanh.f32 %v404_v21 }
 0x156   : > { %v726_v28 = vpop.eup %725  ;;  %v425_v30 = vmul.f32 0.5, %v724_v25  ;;  %463 = vst [vmem:[%s1127_s17 + $0x40] sm:$0xff] %v447_v26 }
 0x157   : > { %v728_v31 = vpop.eup %727  ;;  %v448_v32 = vadd.f32 0.5, %v432_v27  ;;  %v433_v33 = vmul.f32 0.5, %v726_v28  ;;  %456 = vst [vmem:[%s1127_s17 + $0x8] sm:$0xff] %v440_v29 }
 0x158   : > { %v730_v34 = vpop.eup %729  ;;  %v441_v35 = vadd.f32 0.5, %v425_v30  ;;  %v426_v36 = vmul.f32 0.5, %v728_v31 }
 0x159   : > { %v732_v37 = vpop.eup %731  ;;  %464 = vst [vmem:[%s1127_s17 + $0x48] sm:$0xff] %v448_v32  ;;  %v449_v38 = vadd.f32 0.5, %v433_v33  ;;  %v434_v39 = vmul.f32 0.5, %v730_v34 }
 0x15a   : > { %v734_v40 = vpop.eup %733  ;;  %457 = vst [vmem:[%s1127_s17 + $0x10] sm:$0xff] %v441_v35  ;;  %v442_v41 = vadd.f32 0.5, %v426_v36  ;;  %v427_v42 = vmul.f32 0.5, %v732_v37 }
 0x15b   : > { %v736_v43 = vpop.eup %735  ;;  %465 = vst [vmem:[%s1127_s17 + $0x50] sm:$0xff] %v449_v38  ;;  %v450_v44 = vadd.f32 0.5, %v434_v39  ;;  %v435_v45 = vmul.f32 0.5, %v734_v40 }
 0x15c   : > { %v738_v46 = vpop.eup %737  ;;  %458 = vst [vmem:[%s1127_s17 + $0x18] sm:$0xff] %v442_v41  ;;  %v443_v47 = vadd.f32 0.5, %v427_v42  ;;  %v428_v48 = vmul.f32 0.5, %v736_v43 }
 0x15d   : > { %v740_v49 = vpop.eup %739  ;;  %466 = vst [vmem:[%s1127_s17 + $0x58] sm:$0xff] %v450_v44  ;;  %v451_v50 = vadd.f32 0.5, %v435_v45  ;;  %v436_v51 = vmul.f32 0.5, %v738_v46 }
 0x15e   : > { %v742_v52 = vpop.eup %741  ;;  %459 = vst [vmem:[%s1127_s17 + $0x20] sm:$0xff] %v443_v47  ;;  %v444_v53 = vadd.f32 0.5, %v428_v48  ;;  %v429_v54 = vmul.f32 0.5, %v740_v49 }
 0x15f   : > { %v744_v55 = vpop.eup %743  ;;  %467 = vst [vmem:[%s1127_s17 + $0x60] sm:$0xff] %v451_v50  ;;  %v452_v56 = vadd.f32 0.5, %v436_v51  ;;  %v437_v57 = vmul.f32 0.5, %v742_v52 }
 0x160   : > { %v746_v58 = vpop.eup %745  ;;  %460 = vst [vmem:[%s1127_s17 + $0x28] sm:$0xff] %v444_v53  ;;  %v445_v59 = vadd.f32 0.5, %v429_v54  ;;  %v430_v60 = vmul.f32 0.5, %v744_v55 }
 0x161   : > { %468 = vst [vmem:[%s1127_s17 + $0x68] sm:$0xff] %v452_v56  ;;  %v453_v61 = vadd.f32 0.5, %v437_v57  ;;  %v438_v62 = vmul.f32 0.5, %v746_v58 }
 0x162   : > { %461 = vst [vmem:[%s1127_s17 + $0x30] sm:$0xff] %v445_v59  ;;  %v446_v63 = vadd.f32 0.5, %v430_v60 }
 0x163   : > { %469 = vst [vmem:[%s1127_s17 + $0x70] sm:$0xff] %v453_v61  ;;  %v454_v1 = vadd.f32 0.5, %v438_v62 }
 0x164   : > { %462 = vst [vmem:[%s1127_s17 + $0x38] sm:$0xff] %v446_v63 }
 0x165   : > { %470 = vst [vmem:[%s1127_s17 + $0x78] sm:$0xff] %v454_v1 }
 0x166   : > { %818 = shalt.err (!%p815_p5)
}
 0x167   : > { %s819_s30 = scalar_lea.hbm %s1147_s6, 2048  ;;  %s823_s8 = scalar_lea.hbm %s1203_s2, 4096 }
 0x168   : > { %p820_p9 = scmp.ne.s32.totalorder %s1147_s6, %s819_s30  ;;  %p824_p3 = scmp.lt.u32.totalorder %s1147_s6, %s1203_s2 }
 0x169   : > { %p825_p7 = scmp.lt.u32.totalorder %s823_s8, %s819_s30  ;;  %p827_p4 = scmp.lt.u32.totalorder %s819_s30, %s1147_s6 }
 0x16a   : > { %p821_p1 = pnand %p820_p9, %p1014_p10 }
 0x16b   : > { %p826_p13 = por %p825_p7, %p824_p3 }
 0x16c   : > { %p822_p2 = pneg %p821_p1 }
 0x16d   : > { %p828_p6 = por %p827_p4, %p826_p13 }
 0x16f   : > { %p829_p8 = pnand %p828_p6, %p822_p2 }
 0x171   : > { %832 = shalt.err (!%p829_p8)
}
 0x172   : > { %s901_s24 = smov 256   ;;  %s902_s17 = smov 16  }
 0x173   : > { %641 = dma.vmem_to_hbm [thread:$0]  (%p1014_p10), %s1149_s21, 2048, %s1147_s6, %s472_s12, %s901_s24, %s901_s24, %s902_s17  }
 0x174 PF: > { %s502_s19 = sand.u32 1, %s871_s9   ;;  %p1221_p12 = scmp.ne.s32.totalorder %s1211_s20, 0 }
 0x175   : > { %p1222_p11 = scmp.ge.s32.totalorder %s891_s14, 2  ;;  %s503_s4 = scalar_lea.sflag [#allocation4], %s502_s19 }
 0x177   : > { %p652_p0 = pnand %p1222_p11, %p1221_p12 }
 0x179   : > { %866 = dma.done.wait (!%p652_p0), %s503_s4, 2048  }
 0x17a   : > { %868 = vsyncadd (!%p652_p0), %s503_s4, 4294965248  ;;  %s19_s14 = sadd.s32 1, %s891_s14   ;;  %s1223_s9 = smov %s875_s10 }
 0x17b   : > { %p16_p5 = scmp.ge.s32.totalorder %s19_s14, 4   ;;  %s1224_s10 = smov %s879_s11 }
 0x17c   : > { %s1225_s11 = smov %s1023_s28  ;;  %s1226_s12 = smov %s887_s13 }
 0x17d   : > { %s1227_s13 = smov %s1229_s25  ;;  %18 = sbr.rel (!%p16_p5) target bundleno = 7 (0x7), region = 77 }
 0x184   :  { %508 = vsyncpa [#allocation3], 1 }
 0x185   :  { %510 = vsyncpa [#allocation3 + $0x1], 1 }
 0x186   :  { %511 = vsyncpa [#allocation6], 1 }
 0x187   :  { %512 = vsyncpa [#allocation4], 1 }
 0x188   :  { %514 = vsyncpa [#allocation4 + $0x1], 1 }

</bundles_post_ra>
